<compile_context>
chip_gen: v7x
topology: tpu7x:2x2x1
jax: 0.10.0
libtpu: 0.0.40
codegen_flags: <defaults>
</compile_context>

<pallas_src>
import jax
import jax.numpy as jnp
from jax.experimental import pallas as pl
from jax.experimental.pallas import tpu as pltpu

IMG_FEAT = 400            # classic LeNet-5 flattened conv feature (16*5*5)
SND_FEAT = 80             # sound_mean dimension: 400 + 80 == 480 == fc1 in-features
CAT_FEAT = IMG_FEAT + SND_FEAT   # 480
HID = 64
NCLS = 10

TILE_B_MAX = 1024         # rows per grid step (needs vmem_limit_bytes bump, set below)
VMEM_LIMIT = 40 * 1024 * 1024   # safe on v5e/v6e (128 MiB phys) and v7x (64 MiB phys)


def _round_up(n, m):
    return ((n + m - 1) // m) * m


def _softplus(x):
    # Branch-free stable softplus: max(x,0) + log(1 + exp(-|x|)).
    # Matches nn.Softplus(beta=1, threshold=20) to well within 1e-4.
    return jnp.maximum(x, 0.0) + jnp.log(1.0 + jnp.exp(-jnp.abs(x)))


def head_kernel(img_ref, snd_ref, enc1_ref, enc2_ref, w1_ref, b1_ref, w2_ref, b2_ref,
                out_ref, f_ref, f1_ref):
    tb = f_ref.shape[0]

    # ---- fused expand + concat, entirely in vregs -------------------------
    # snd_emb already carries zeros in lanes [0, 400); zero-extend img to 480
    # lanes in-register, add, and do a single dense store into the f block.
    img_pad = jnp.concatenate(
        [img_ref[...], jnp.zeros((tb, SND_FEAT), jnp.float32)], axis=-1)
    snd_b = jnp.broadcast_to(snd_ref[...], (tb, CAT_FEAT))

    # x = softplus(encoder(fc1)) + cat([img_feature, sound_feature])
    f_ref[...] = _softplus(enc1_ref[...]) + snd_b + img_pad

    # x = relu(fc1(x))  — feed the MXU from the just-written f block so no
    # second 480-wide VMEM temporary is kept alive.
    h = jnp.dot(f_ref[...], w1_ref[...], preferred_element_type=jnp.float32) + b1_ref[...]
    h = jnp.maximum(h, 0.0)

    # x = softplus(encoder(fc2)) + x
    f1_ref[...] = _softplus(enc2_ref[...]) + h

    # dropout(p=0.6): identity (eval mode);  x = fc2(x)
    out_ref[...] = (
        jnp.dot(f1_ref[...], w2_ref[...], preferred_element_type=jnp.float32) + b2_ref[...]
    )


def sound_lenet5_mean_forward(img_feature, sound_mean, enc_fc1, enc_fc2, params):
    """mode='one' forward.  Returns (logits, f, f1) exactly like the module."""
    B = img_feature.shape[0]

    # Pad only to a multiple of 8 (sublane granularity), never to tile_b.
    b_pad = _round_up(B, 8)
    if b_pad != B:
        pad = ((0, b_pad - B), (0, 0))
        img_feature = jnp.pad(img_feature, pad)
        enc_fc1 = jnp.pad(enc_fc1, pad)
        enc_fc2 = jnp.pad(enc_fc2, pad)

    # Tile so large batches get >= ~4 grid steps (v7x 2-TC sharding + DMA
    # double-buffer overlap), capped so the working set fits VMEM.
    tile_b = min(TILE_B_MAX, max(8, _round_up(pl.cdiv(b_pad, 4), 8)))
    grid = (pl.cdiv(b_pad, tile_b),)   # ragged trailing block is masked by Pallas

    # Sound mean pre-embedded at its concat offset, zeros in the img lanes.
    snd_emb = jnp.concatenate(
        [jnp.zeros((IMG_FEAT,), jnp.float32), sound_mean.astype(jnp.float32)]
    )[None, :]                                   # (1, 480)

    w1t = params["fc1_w"].T                      # (480, 64)
    b1 = params["fc1_b"].reshape(1, HID)         # (1, 64)
    w2t = params["fc2_w"].T                      # (64, 10)
    b2 = params["fc2_b"].reshape(1, NCLS)        # (1, 10)

    def row_spec(feat):
        return pl.BlockSpec((tile_b, feat), lambda i: (i, 0))

    def const_spec(r, c):
        return pl.BlockSpec((r, c), lambda i: (0, 0))

    logits, f, f1 = pl.pallas_call(
        head_kernel,
        grid=grid,
        out_shape=(
            jax.ShapeDtypeStruct((b_pad, NCLS), jnp.float32),      # logits
            jax.ShapeDtypeStruct((b_pad, CAT_FEAT), jnp.float32),  # f
            jax.ShapeDtypeStruct((b_pad, HID), jnp.float32),       # f1
        ),
        in_specs=[
            row_spec(IMG_FEAT),          # img_feature      (tile_b, 400)
            const_spec(1, CAT_FEAT),     # snd_emb          (1, 480)
            row_spec(CAT_FEAT),          # enc_fc1          (tile_b, 480)
            row_spec(HID),               # enc_fc2          (tile_b, 64)
            const_spec(CAT_FEAT, HID),   # fc1 weight^T     (480, 64)
            const_spec(1, HID),          # fc1 bias         (1, 64)
            const_spec(HID, NCLS),       # fc2 weight^T     (64, 10)
            const_spec(1, NCLS),         # fc2 bias         (1, 10)
        ],
        out_specs=(
            row_spec(NCLS),
            row_spec(CAT_FEAT),
            row_spec(HID),
        ),
        compiler_params=pltpu.CompilerParams(
            dimension_semantics=("parallel",),
            vmem_limit_bytes=VMEM_LIMIT,
        ),
    )(img_feature, snd_emb, enc_fc1, enc_fc2, w1t, b1, w2t, b2)

    if b_pad != B:
        logits, f, f1 = logits[:B], f[:B], f1[:B]
    return logits, f, f1


def _reference(img_feature, sound_mean, enc_fc1, enc_fc2, params):
    # Mimics PyTorch softplus(beta=1, threshold=20) exactly.
    def sp(x):
        return jnp.where(x > 20.0, x, jnp.log(1.0 + jnp.exp(jnp.minimum(x, 20.0))))

    B = img_feature.shape[0]
    snd = jnp.broadcast_to(sound_mean[None, :], (B, SND_FEAT))
    x = jnp.concatenate([img_feature, snd], axis=1)
    x = sp(enc_fc1) + x
    f = x
    x = jnp.maximum(x @ params["fc1_w"].T + params["fc1_b"], 0.0)
    x = sp(enc_fc2) + x
    f1 = x
    x = x @ params["fc2_w"].T + params["fc2_b"]
    return x, f, f1


def _init_params(key):
    # Deterministic init mimicking nn.Linear default (U(-1/sqrt(fan_in), +)).
    k1, k2, k3, k4 = jax.random.split(key, 4)
    lim1 = 1.0 / jnp.sqrt(float(CAT_FEAT))
    lim2 = 1.0 / jnp.sqrt(float(HID))
    return {
        "fc1_w": jax.random.uniform(k1, (HID, CAT_FEAT), jnp.float32, -lim1, lim1),
        "fc1_b": jax.random.uniform(k2, (HID,), jnp.float32, -lim1, lim1),
        "fc2_w": jax.random.uniform(k3, (NCLS, HID), jnp.float32, -lim2, lim2),
        "fc2_b": jax.random.uniform(k4, (NCLS,), jnp.float32, -lim2, lim2),
    }


if __name__ == "__main__":
    key = jax.random.PRNGKey(0)
    kp, k_img, k_snd, k_e1, k_e2 = jax.random.split(key, 5)

    params = _init_params(kp)

    B = 8
    img_feature = jax.random.normal(k_img, (B, IMG_FEAT), jnp.float32)   # img_extractor output
    sound_mean = jax.random.normal(k_snd, (SND_FEAT,), jnp.float32)      # sound_mean arg
    enc_fc1 = jax.random.normal(k_e1, (B, CAT_FEAT), jnp.float32)        # encoder({'fc1': ...})['fc1']
    enc_fc2 = jax.random.normal(k_e2, (B, HID), jnp.float32)             # encoder({'fc2': ...})['fc2']

    fwd = jax.jit(sound_lenet5_mean_forward)
    logits, f, f1 = jax.block_until_ready(
        fwd(img_feature, sound_mean, enc_fc1, enc_fc2, params)
    )

    r_logits, r_f, r_f1 = _reference(img_feature, sound_mean, enc_fc1, enc_fc2, params)
    assert logits.shape == (B, NCLS) and f.shape == (B, CAT_FEAT) and f1.shape == (B, HID)
    assert jnp.allclose(logits, r_logits, atol=1e-4, rtol=1e-4)
    assert jnp.allclose(f, r_f, atol=1e-4, rtol=1e-4)
    assert jnp.allclose(f1, r_f1, atol=1e-4, rtol=1e-4)

    print("KERNEL_OK")
</pallas_src>

<mosaic_0001>
module attributes {stable_mosaic.version = 11 : i64} {
  func.func @head_kernel(%arg0: i32, %arg1: memref<8x400xf32, #tpu.memory_space<vmem>>, %arg2: memref<1x480xf32, #tpu.memory_space<vmem>>, %arg3: memref<8x480xf32, #tpu.memory_space<vmem>>, %arg4: memref<8x64xf32, #tpu.memory_space<vmem>>, %arg5: memref<480x64xf32, #tpu.memory_space<vmem>>, %arg6: memref<1x64xf32, #tpu.memory_space<vmem>>, %arg7: memref<64x10xf32, #tpu.memory_space<vmem>>, %arg8: memref<1x10xf32, #tpu.memory_space<vmem>>, %arg9: memref<8x10xf32, #tpu.memory_space<vmem>>, %arg10: memref<8x480xf32, #tpu.memory_space<vmem>>, %arg11: memref<8x64xf32, #tpu.memory_space<vmem>>) attributes {dimension_semantics = [#tpu.dimension_semantics<parallel>], iteration_bounds = array<i64: 1>, scalar_prefetch = 0 : i64, scratch_operands = 0 : i64, tpu.core_type = #tpu.core_type<tc>, window_params = [{transform_indices = @transform_0, window_bounds = array<i64: 8, 400>}, {pipeline_mode = #tpu.pipeline_mode<synchronous>, transform_indices = @transform_1, window_bounds = array<i64: 1, 480>}, {transform_indices = @transform_2, window_bounds = array<i64: 8, 480>}, {transform_indices = @transform_3, window_bounds = array<i64: 8, 64>}, {pipeline_mode = #tpu.pipeline_mode<synchronous>, transform_indices = @transform_4, window_bounds = array<i64: 480, 64>}, {pipeline_mode = #tpu.pipeline_mode<synchronous>, transform_indices = @transform_5, window_bounds = array<i64: 1, 64>}, {pipeline_mode = #tpu.pipeline_mode<synchronous>, transform_indices = @transform_6, window_bounds = array<i64: 64, 10>}, {pipeline_mode = #tpu.pipeline_mode<synchronous>, transform_indices = @transform_7, window_bounds = array<i64: 1, 10>}, {transform_indices = @transform_8, window_bounds = array<i64: 8, 10>}, {transform_indices = @transform_9, window_bounds = array<i64: 8, 480>}, {transform_indices = @transform_10, window_bounds = array<i64: 8, 64>}]} {
    %c0 = arith.constant 0 : index
    %c0_0 = arith.constant 0 : index
    %0 = vector.load %arg1[%c0, %c0_0] : memref<8x400xf32, #tpu.memory_space<vmem>>, vector<8x400xf32>
    %cst = arith.constant 0.000000e+00 : f32
    %1 = vector.broadcast %cst : f32 to vector<8x80xf32>
    %2 = tpu.concatenate %0, %1 in 1 : vector<8x400xf32>, vector<8x80xf32> -> vector<8x480xf32>
    %c0_1 = arith.constant 0 : index
    %c0_2 = arith.constant 0 : index
    %3 = vector.load %arg2[%c0_1, %c0_2] : memref<1x480xf32, #tpu.memory_space<vmem>>, vector<1x480xf32>
    %4 = vector.shape_cast %3 : vector<1x480xf32> to vector<1x480xf32>
    %5 = vector.broadcast %4 : vector<1x480xf32> to vector<8x480xf32>
    %c0_3 = arith.constant 0 : index
    %c0_4 = arith.constant 0 : index
    %6 = vector.load %arg3[%c0_3, %c0_4] : memref<8x480xf32, #tpu.memory_space<vmem>>, vector<8x480xf32>
    %cst_5 = arith.constant 0.000000e+00 : f32
    %7 = vector.broadcast %cst_5 : f32 to vector<8x480xf32>
    %8 = arith.maximumf %6, %7 : vector<8x480xf32>
    %9 = math.absf %6 : vector<8x480xf32>
    %cst_6 = arith.constant 0.000000e+00 : f32
    %10 = vector.broadcast %cst_6 : f32 to vector<8x480xf32>
    %11 = arith.subf %10, %9 : vector<8x480xf32>
    %12 = math.exp %11 : vector<8x480xf32>
    %cst_7 = arith.constant 1.000000e+00 : f32
    %13 = vector.broadcast %cst_7 : f32 to vector<8x480xf32>
    %14 = arith.addf %13, %12 : vector<8x480xf32>
    %15 = math.log %14 : vector<8x480xf32>
    %16 = arith.addf %8, %15 : vector<8x480xf32>
    %17 = arith.addf %16, %5 : vector<8x480xf32>
    %18 = arith.addf %17, %2 : vector<8x480xf32>
    %c0_8 = arith.constant 0 : index
    %c0_9 = arith.constant 0 : index
    %19 = vector.load %arg10[%c0_8, %c0_9] : memref<8x480xf32, #tpu.memory_space<vmem>>, vector<8x480xf32>
    tpu.vector_store %arg10[%c0_8, %c0_9], %18 {strides = array<i32>} : memref<8x480xf32, #tpu.memory_space<vmem>>, vector<8x480xf32>,
    %c0_10 = arith.constant 0 : index
    %c0_11 = arith.constant 0 : index
    %20 = vector.load %arg10[%c0_10, %c0_11] : memref<8x480xf32, #tpu.memory_space<vmem>>, vector<8x480xf32>
    %c0_12 = arith.constant 0 : index
    %c0_13 = arith.constant 0 : index
    %21 = vector.load %arg5[%c0_12, %c0_13] : memref<480x64xf32, #tpu.memory_space<vmem>>, vector<480x64xf32>
    %cst_14 = arith.constant dense<0.000000e+00> : vector<8x64xf32>
    %22 = tpu.matmul %20, %21, %cst_14 {dimension_numbers = #tpu.dot_dimension_numbers<[1], [0], [0], [1], [0, 0, 1, 1], [], []>} : vector<8x480xf32>, vector<480x64xf32>, vector<8x64xf32> -> vector<8x64xf32>
    %c0_15 = arith.constant 0 : index
    %c0_16 = arith.constant 0 : index
    %23 = vector.load %arg6[%c0_15, %c0_16] : memref<1x64xf32, #tpu.memory_space<vmem>>, vector<1x64xf32>
    %24 = vector.broadcast %23 : vector<1x64xf32> to vector<8x64xf32>
    %25 = arith.addf %22, %24 : vector<8x64xf32>
    %cst_17 = arith.constant 0.000000e+00 : f32
    %26 = vector.broadcast %cst_17 : f32 to vector<8x64xf32>
    %27 = arith.maximumf %25, %26 : vector<8x64xf32>
    %c0_18 = arith.constant 0 : index
    %c0_19 = arith.constant 0 : index
    %28 = vector.load %arg4[%c0_18, %c0_19] : memref<8x64xf32, #tpu.memory_space<vmem>>, vector<8x64xf32>
    %cst_20 = arith.constant 0.000000e+00 : f32
    %29 = vector.broadcast %cst_20 : f32 to vector<8x64xf32>
    %30 = arith.maximumf %28, %29 : vector<8x64xf32>
    %31 = math.absf %28 : vector<8x64xf32>
    %cst_21 = arith.constant 0.000000e+00 : f32
    %32 = vector.broadcast %cst_21 : f32 to vector<8x64xf32>
    %33 = arith.subf %32, %31 : vector<8x64xf32>
    %34 = math.exp %33 : vector<8x64xf32>
    %cst_22 = arith.constant 1.000000e+00 : f32
    %35 = vector.broadcast %cst_22 : f32 to vector<8x64xf32>
    %36 = arith.addf %35, %34 : vector<8x64xf32>
    %37 = math.log %36 : vector<8x64xf32>
    %38 = arith.addf %30, %37 : vector<8x64xf32>
    %39 = arith.addf %38, %27 : vector<8x64xf32>
    %c0_23 = arith.constant 0 : index
    %c0_24 = arith.constant 0 : index
    %40 = vector.load %arg11[%c0_23, %c0_24] : memref<8x64xf32, #tpu.memory_space<vmem>>, vector<8x64xf32>
    tpu.vector_store %arg11[%c0_23, %c0_24], %39 {strides = array<i32>} : memref<8x64xf32, #tpu.memory_space<vmem>>, vector<8x64xf32>,
    %c0_25 = arith.constant 0 : index
    %c0_26 = arith.constant 0 : index
    %41 = vector.load %arg11[%c0_25, %c0_26] : memref<8x64xf32, #tpu.memory_space<vmem>>, vector<8x64xf32>
    %c0_27 = arith.constant 0 : index
    %c0_28 = arith.constant 0 : index
    %42 = vector.load %arg7[%c0_27, %c0_28] : memref<64x10xf32, #tpu.memory_space<vmem>>, vector<64x10xf32>
    %cst_29 = arith.constant dense<0.000000e+00> : vector<8x10xf32>
    %43 = tpu.matmul %41, %42, %cst_29 {dimension_numbers = #tpu.dot_dimension_numbers<[1], [0], [0], [1], [0, 0, 1, 1], [], []>} : vector<8x64xf32>, vector<64x10xf32>, vector<8x10xf32> -> vector<8x10xf32>
    %c0_30 = arith.constant 0 : index
    %c0_31 = arith.constant 0 : index
    %44 = vector.load %arg8[%c0_30, %c0_31] : memref<1x10xf32, #tpu.memory_space<vmem>>, vector<1x10xf32>
    %45 = vector.broadcast %44 : vector<1x10xf32> to vector<8x10xf32>
    %46 = arith.addf %43, %45 : vector<8x10xf32>
    %c0_32 = arith.constant 0 : index
    %c0_33 = arith.constant 0 : index
    %47 = vector.load %arg9[%c0_32, %c0_33] : memref<8x10xf32, #tpu.memory_space<vmem>>, vector<8x10xf32>
    tpu.vector_store %arg9[%c0_32, %c0_33], %46 {strides = array<i32>} : memref<8x10xf32, #tpu.memory_space<vmem>>, vector<8x10xf32>,
    return
  }
  func.func @transform_0(%arg0: i32) -> (i32, i32) {
    %c0_i32 = arith.constant 0 : i32
    %c0_i32_0 = arith.constant 0 : i32
    return %arg0, %c0_i32 : i32, i32
  }
  func.func @transform_1(%arg0: i32) -> (i32, i32) {
    %c0_i32 = arith.constant 0 : i32
    %c0_i32_0 = arith.constant 0 : i32
    %c0_i32_1 = arith.constant 0 : i32
    return %c0_i32, %c0_i32_0 : i32, i32
  }
  func.func @transform_2(%arg0: i32) -> (i32, i32) {
    %c0_i32 = arith.constant 0 : i32
    %c0_i32_0 = arith.constant 0 : i32
    return %arg0, %c0_i32 : i32, i32
  }
  func.func @transform_3(%arg0: i32) -> (i32, i32) {
    %c0_i32 = arith.constant 0 : i32
    %c0_i32_0 = arith.constant 0 : i32
    return %arg0, %c0_i32 : i32, i32
  }
  func.func @transform_4(%arg0: i32) -> (i32, i32) {
    %c0_i32 = arith.constant 0 : i32
    %c0_i32_0 = arith.constant 0 : i32
    %c0_i32_1 = arith.constant 0 : i32
    return %c0_i32, %c0_i32_0 : i32, i32
  }
  func.func @transform_5(%arg0: i32) -> (i32, i32) {
    %c0_i32 = arith.constant 0 : i32
    %c0_i32_0 = arith.constant 0 : i32
    %c0_i32_1 = arith.constant 0 : i32
    return %c0_i32, %c0_i32_0 : i32, i32
  }
  func.func @transform_6(%arg0: i32) -> (i32, i32) {
    %c0_i32 = arith.constant 0 : i32
    %c0_i32_0 = arith.constant 0 : i32
    %c0_i32_1 = arith.constant 0 : i32
    return %c0_i32, %c0_i32_0 : i32, i32
  }
  func.func @transform_7(%arg0: i32) -> (i32, i32) {
    %c0_i32 = arith.constant 0 : i32
    %c0_i32_0 = arith.constant 0 : i32
    %c0_i32_1 = arith.constant 0 : i32
    return %c0_i32, %c0_i32_0 : i32, i32
  }
  func.func @transform_8(%arg0: i32) -> (i32, i32) {
    %c0_i32 = arith.constant 0 : i32
    %c0_i32_0 = arith.constant 0 : i32
    return %arg0, %c0_i32 : i32, i32
  }
  func.func @transform_9(%arg0: i32) -> (i32, i32) {
    %c0_i32 = arith.constant 0 : i32
    %c0_i32_0 = arith.constant 0 : i32
    return %arg0, %c0_i32 : i32, i32
  }
  func.func @transform_10(%arg0: i32) -> (i32, i32) {
    %c0_i32 = arith.constant 0 : i32
    %c0_i32_0 = arith.constant 0 : i32
    return %arg0, %c0_i32 : i32, i32
  }
}

</mosaic_0001>

<bundles_post_ra>
// kernel: sound_lenet5_mean_forward.1
= control target key start
LH: loop header
LB: loop body
LE: loop exit
PB: predicated region body
PF: predicated region fallthrough
CT: control target
= control target key end

     0   :  { %16 = vsyncpa [#allocation3], 0  ;;  %v724_v3 = vmov 0.0|0.0   ;;  %s1095_s0 = inlined_call_operand.vmem [shape: f32[8,400], index: 0, kind: input, shape index: {}]   ;;  %s1096_s1 = inlined_call_operand.vmem [shape: f32[1,480], index: 1, kind: input, shape index: {}]   ;;  %s1097_s2 = inlined_call_operand.vmem [shape: f32[8,480], index: 2, kind: input, shape index: {}]   ;;  %s1098_s3 = inlined_call_operand.vmem [shape: f32[8,64], index: 3, kind: input, shape index: {}]   ;;  %s1099_s4 = inlined_call_operand.vmem [shape: f32[480,64], index: 4, kind: input, shape index: {}]   ;;  %s1100_s5 = inlined_call_operand.vmem [shape: f32[1,64], index: 5, kind: input, shape index: {}]   ;;  %s1101_s6 = inlined_call_operand.vmem [shape: f32[64,10], index: 6, kind: input, shape index: {}]   ;;  %s1102_s7 = inlined_call_operand.vmem [shape: f32[1,10], index: 7, kind: input, shape index: {}]   ;;  %s1103_s8 = inlined_call_operand.hbm [shape: f32[8,10], index: 8, kind: output, shape index: {0}]   ;;  %s1104_s9 = inlined_call_operand.hbm [shape: f32[8,480], index: 9, kind: output, shape index: {1}]   ;;  %s1105_s10 = inlined_call_operand.hbm [shape: f32[8,64], index: 10, kind: output, shape index: {2}]  }
   0x1   :  { %v151_v0 = vld [vmem:[%s1099_s4 + $0x100] sm:$0xff]  ;;  %v152_v1 = vld [vmem:[%s1099_s4 + $0x108] sm:$0xff]  ;;  %v153_v2 = vld [vmem:[%s1099_s4 + $0x110] sm:$0xff]  ;;  %574 = vmatprep.subr.bf16.mxu1 %v724_v3 }
   0x2   :  { %v575_v4 = vpack.c.bf16 %v152_v1, %v151_v0  ;;  %v154_v5 = vld [vmem:[%s1099_s4 + $0x118] sm:$0xff]  ;;  %v155_v7 = vld [vmem:[%s1099_s4 + $0x120] sm:$0xff]  ;;  %v136_v9 = vld [vmem:[%s1099_s4 + $0x88] sm:$0xff] }
   0x3   :  { %v578_v6 = vpack.c.bf16 %v154_v5, %v153_v2  ;;  %v135_v8 = vld [vmem:[%s1099_s4 + $0x80] sm:$0xff]  ;;  %v156_v10 = vld [vmem:[%s1099_s4 + $0x128] sm:$0xff]  ;;  %v137_v15 = vld [vmem:[%s1099_s4 + $0x90] sm:$0xff] }
   0x4   :  { %576 = vmatpush1.bf16.msra.mxu1 %v575_v4  ;;  %v542_v11 = vpack.c.bf16 %v136_v9, %v135_v8  ;;  %v119_v12 = vld [vmem:[%s1099_s4] sm:$0xff]  ;;  %v120_v13 = vld [vmem:[%s1099_s4 + $0x8] sm:$0xff]  ;;  %v138_v16 = vld [vmem:[%s1099_s4 + $0x98] sm:$0xff]  ;;  %v581_v20 = vpack.c.bf16 %v156_v10, %v155_v7 }
   0x5   :  { %577 = vmatprep.subr.bf16.mxu1 %v724_v3  ;;  %v544_v14 = vpack.c.bf16 %v120_v13, %v119_v12  ;;  %v546_v17 = vpack.c.bf16 %v138_v16, %v137_v15  ;;  %v121_v18 = vld [vmem:[%s1099_s4 + $0x10] sm:$0xff]  ;;  %v122_v19 = vld [vmem:[%s1099_s4 + $0x18] sm:$0xff]  ;;  %v139_v23 = vld [vmem:[%s1099_s4 + $0xa0] sm:$0xff] }
   0x6   :  { %543 = vmatprep.subr.bf16.mxu0 %v542_v11  ;;  %v157_v21 = vld [vmem:[%s1099_s4 + $0x130] sm:$0xff]  ;;  %v548_v22 = vpack.c.bf16 %v122_v19, %v121_v18  ;;  %v140_v24 = vld [vmem:[%s1099_s4 + $0xa8] sm:$0xff]  ;;  %v158_v25 = vld [vmem:[%s1099_s4 + $0x138] sm:$0xff] }
   0x7   :  { %545 = vmatpush3.bf16.msra.mxu0 %v544_v14  ;;  %v550_v26 = vpack.c.bf16 %v140_v24, %v139_v23  ;;  %v123_v27 = vld [vmem:[%s1099_s4 + $0x20] sm:$0xff]  ;;  %v124_v28 = vld [vmem:[%s1099_s4 + $0x28] sm:$0xff]  ;;  %v141_v29 = vld [vmem:[%s1099_s4 + $0xb0] sm:$0xff]  ;;  %v584_v31 = vpack.c.bf16 %v158_v25, %v157_v21 }
   0x8   :  { %579 = vmatpush1.bf16.msra.mxu1 %v578_v6  ;;  %547 = vmatprep.subr.bf16.mxu0 %v546_v17  ;;  %v142_v30 = vld [vmem:[%s1099_s4 + $0xb8] sm:$0xff]  ;;  %v159_v32 = vld [vmem:[%s1099_s4 + $0x140] sm:$0xff]  ;;  %v552_v33 = vpack.c.bf16 %v124_v28, %v123_v27  ;;  %v160_v34 = vld [vmem:[%s1099_s4 + $0x148] sm:$0xff] }
   0x9   :  { %580 = vmatprep.subr.bf16.mxu1 %v724_v3  ;;  %v554_v35 = vpack.c.bf16 %v142_v30, %v141_v29  ;;  %v125_v36 = vld [vmem:[%s1099_s4 + $0x30] sm:$0xff]  ;;  %v126_v37 = vld [vmem:[%s1099_s4 + $0x38] sm:$0xff]  ;;  %v143_v38 = vld [vmem:[%s1099_s4 + $0xc0] sm:$0xff]  ;;  %v587_v40 = vpack.c.bf16 %v160_v34, %v159_v32 }
   0xa   :  { %v144_v39 = vld [vmem:[%s1099_s4 + $0xc8] sm:$0xff]  ;;  %v161_v41 = vld [vmem:[%s1099_s4 + $0x150] sm:$0xff]  ;;  %v556_v42 = vpack.c.bf16 %v126_v37, %v125_v36  ;;  %v162_v43 = vld [vmem:[%s1099_s4 + $0x158] sm:$0xff] }
   0xb   :  { %549 = vmatpush3.bf16.msra.mxu0 %v548_v22  ;;  %v558_v44 = vpack.c.bf16 %v144_v39, %v143_v38  ;;  %v127_v45 = vld [vmem:[%s1099_s4 + $0x40] sm:$0xff]  ;;  %v128_v46 = vld [vmem:[%s1099_s4 + $0x48] sm:$0xff]  ;;  %v145_v47 = vld [vmem:[%s1099_s4 + $0xd0] sm:$0xff]  ;;  %v590_v49 = vpack.c.bf16 %v162_v43, %v161_v41 }
   0xc   :  { %582 = vmatpush1.bf16.msra.mxu1 %v581_v20  ;;  %551 = vmatprep.subr.bf16.mxu0 %v550_v26  ;;  %v146_v48 = vld [vmem:[%s1099_s4 + $0xd8] sm:$0xff]  ;;  %v163_v50 = vld [vmem:[%s1099_s4 + $0x160] sm:$0xff]  ;;  %v164_v51 = vld [vmem:[%s1099_s4 + $0x168] sm:$0xff]  ;;  %v560_v52 = vpack.c.bf16 %v128_v46, %v127_v45 }
   0xd   :  { %583 = vmatprep.subr.bf16.mxu1 %v724_v3  ;;  %v901_v53 = vld [vmem:[%s1097_s2 + $0x8] sm:$0xff]  ;;  %v562_v54 = vpack.c.bf16 %v146_v48, %v145_v47  ;;  %v129_v55 = vld [vmem:[%s1099_s4 + $0x50] sm:$0xff]  ;;  %v130_v56 = vld [vmem:[%s1099_s4 + $0x58] sm:$0xff]  ;;  %v593_v2 = vpack.c.bf16 %v164_v51, %v163_v50 }
   0xe   :  { %v71_v57 = vand.u32 2147483647, %v901_v53  ;;  %v914_v58 = vld [vmem:[%s1097_s2] sm:$0xff]  ;;  %v148_v60 = vld [vmem:[%s1099_s4 + $0xe8] sm:$0xff]  ;;  %v165_v62 = vld [vmem:[%s1099_s4 + $0x170] sm:$0xff]  ;;  %v564_v5 = vpack.c.bf16 %v130_v56, %v129_v55 }
   0xf   :  { %553 = vmatpush3.bf16.msra.mxu0 %v552_v33  ;;  %v147_v59 = vld [vmem:[%s1099_s4 + $0xe0] sm:$0xff]  ;;  %v70_v61 = vand.u32 2147483647, %v914_v58  ;;  %v929_v0 = vld [vmem:[%s1097_s2 + $0x18] sm:$0xff]  ;;  %v934_v1 = vld [vmem:[%s1097_s2 + $0x10] sm:$0xff] }
  0x10   :  { %585 = vmatpush1.bf16.msra.mxu1 %v584_v31  ;;  %555 = vmatprep.subr.bf16.mxu0 %v554_v35  ;;  %v75_v63 = vsub.f32 0.0, %v71_v57  ;;  %v166_v4 = vld [vmem:[%s1099_s4 + $0x178] sm:$0xff]  ;;  %v131_v6 = vld [vmem:[%s1099_s4 + $0x60] sm:$0xff]  ;;  %v132_v7 = vld [vmem:[%s1099_s4 + $0x68] sm:$0xff]  ;;  %v73_v9 = vand.u32 2147483647, %v929_v0  ;;  %v566_v10 = vpack.c.bf16 %v148_v60, %v147_v59 }
  0x11   :  { %586 = vmatprep.subr.bf16.mxu1 %v724_v3  ;;  %v74_v8 = vsub.f32 0.0, %v70_v61  ;;  %v72_v12 = vand.u32 2147483647, %v934_v1 }
  0x12   :  { %v80_v11 = vmul.f32 1.442695, %v75_v63 }
  0x13   :  { %557 = vmatpush3.bf16.msra.mxu0 %v556_v42 }
  0x14   :  { %588 = vmatpush1.bf16.msra.mxu1 %v587_v40  ;;  %559 = vmatprep.subr.bf16.mxu0 %v558_v44 }
  0x15   :  { %589 = vmatprep.subr.bf16.mxu1 %v724_v3 }
  0x17   :  { %561 = vmatpush3.bf16.msra.mxu0 %v560_v52 }
  0x18   :  { %591 = vmatpush1.bf16.msra.mxu1 %v590_v49  ;;  %563 = vmatprep.subr.bf16.mxu0 %v562_v54 }
  0x19   :  { %592 = vmatprep.subr.bf16.mxu1 %v724_v3 }
  0x1a   :  { %17 = vsyncpa [#allocation5], 0  ;;  %v149_v13 = vld [vmem:[%s1099_s4 + $0xf0] sm:$0xff]  ;;  %v150_v14 = vld [vmem:[%s1099_s4 + $0xf8] sm:$0xff]  ;;  %v78_v15 = vmul.f32 1.442695, %v74_v8  ;;  %634 = vpow2.f32 %v80_v11  ;;  %v596_v18 = vpack.c.bf16 %v166_v4, %v165_v62  ;;  %v568_v20 = vpack.c.bf16 %v132_v7, %v131_v6 }
  0x1b   :  { %v77_v16 = vsub.f32 0.0, %v73_v9  ;;  %v76_v17 = vsub.f32 0.0, %v72_v12  ;;  %v167_v19 = vld [vmem:[%s1099_s4 + $0x180] sm:$0xff]  ;;  %565 = vmatpush3.bf16.msra.mxu0 %v564_v5  ;;  %v168_v22 = vld [vmem:[%s1099_s4 + $0x188] sm:$0xff]  ;;  %v570_v23 = vpack.c.bf16 %v150_v14, %v149_v13  ;;  %v133_v24 = vld [vmem:[%s1099_s4 + $0x70] sm:$0xff]  ;;  %v42_v43 = vlaneseq }
  0x1c   :  { %594 = vmatpush1.bf16.msra.mxu1 %v593_v2  ;;  %636 = vpow2.f32 %v78_v15  ;;  %567 = vmatprep.subr.bf16.mxu0 %v566_v10  ;;  %v134_v25 = vld [vmem:[%s1099_s4 + $0x78] sm:$0xff]  ;;  %v599_v27 = vpack.c.bf16 %v168_v22, %v167_v19  ;;  %v169_v29 = vld [vmem:[%s1099_s4 + $0x190] sm:$0xff]  ;;  %v171_v33 = vld [vmem:[%s1099_s4 + $0x1a0] sm:$0xff]  ;;  %v67_v54 = vmax.f32 %v901_v53, 0.0  ;;  %v66_v60 = vmax.f32 %v914_v58, 0.0 }
  0x1d   :  { %v84_v21 = vmul.f32 1.442695, %v77_v16  ;;  %595 = vmatprep.subr.bf16.mxu1 %v724_v3  ;;  %v82_v26 = vmul.f32 1.442695, %v76_v17  ;;  %v572_v28 = vpack.c.bf16 %v134_v25, %v133_v24  ;;  %v170_v30 = vld [vmem:[%s1099_s4 + $0x198] sm:$0xff]  ;;  %v172_v34 = vld [vmem:[%s1099_s4 + $0x1a8] sm:$0xff] }
  0x1e   :  { %v602_v31 = vpack.c.bf16 %v170_v30, %v169_v29  ;;  %v605_v39 = vpack.c.bf16 %v172_v34, %v171_v33  ;;  %v173_v41 = vld [vmem:[%s1099_s4 + $0x1b0] sm:$0xff]  ;;  %v174_v42 = vld [vmem:[%s1099_s4 + $0x1b8] sm:$0xff]  ;;  %v43_v47 = vshrl.u32 %v42_v43, 7  ;;  %v175_v48 = vld [vmem:[%s1099_s4 + $0x1c0] sm:$0xff]  ;;  %v69_v7 = vmax.f32 %v929_v0, 0.0 }
  0x1f   :  { %638 = vpow2.f32 %v84_v21  ;;  %569 = vmatpush3.bf16.msra.mxu0 %v568_v20  ;;  %v608_v46 = vpack.c.bf16 %v174_v42, %v173_v41  ;;  %v176_v49 = vld [vmem:[%s1099_s4 + $0x1c8] sm:$0xff]  ;;  %v177_v55 = vld [vmem:[%s1099_s4 + $0x1d0] sm:$0xff]  ;;  %v178_v56 = vld [vmem:[%s1099_s4 + $0x1d8] sm:$0xff]  ;;  %v68_v10 = vmax.f32 %v934_v1, 0.0  ;;  %vm38_vm0 = vcmask 130048  }
  0x20   :  { %640 = vpow2.f32 %v82_v26  ;;  %597 = vmatpush1.bf16.msra.mxu1 %v596_v18  ;;  %571 = vmatprep.subr.bf16.mxu0 %v570_v23  ;;  %v48_v50 = vsub.s32 1, %v43_v47  ;;  %v611_v51 = vpack.c.bf16 %v176_v49, %v175_v48  ;;  %v44_v52 = vsub.s32 0, %v43_v47  ;;  %v40_v59 = vld [vmem:[%s1096_s1] sm:$0xf]  ;;  %v35_v58 = vld [vmem:[%s1095_s0 + $0x8] sm:$0xff]  ;;  %v37_v13 = vld [vmem:[%s1095_s0 + $0x18] sm:$0xff] }
  0x21   :  { %598 = vmatprep.subr.bf16.mxu1 %v724_v3  ;;  %v56_v61 = vsub.s32 3, %v43_v47  ;;  %v52_v53 = vsub.s32 2, %v43_v47  ;;  %v614_v6 = vpack.c.bf16 %v178_v56, %v177_v55  ;;  %v34_v16 = vld [vmem:[%s1095_s0] sm:$0xff]  ;;  %v39_v21 = vsel %vm38_vm0, %v37_v13, 0.0  ;;  %v36_v25 = vld [vmem:[%s1095_s0 + $0x10] sm:$0xff]  ;;  %v347_v34 = vld [vmem:[%s1101_s6 + $0x18] sm:$0xff] }
  0x22   :  { %v49_v63 = vrot.slane %v40_v59, %v48_v50  ;;  %v45_v4 = vrot.slane %v40_v59, %v44_v52  ;;  %vm113_vm1 = vcmask 785408   ;;  %v344_v30 = vld [vmem:[%s1101_s6] sm:$0xff]  ;;  %v346_v33 = vld [vmem:[%s1101_s6 + $0x10] sm:$0xff]  ;;  %vm725_vm2 = vmmov 0  }
  0x23   :  { %573 = vmatpush3.bf16.msra.mxu0 %v572_v28  ;;  %v57_v14 = vrot.slane %v40_v59, %v56_v61  ;;  %v53_v17 = vrot.slane %v40_v59, %v52_v53  ;;  %v726_v42 = vmov 0.0   ;;  %v330_v43 = vld [vmem:[%s1098_s3] sm:$0xff]  ;;  %vm341_vm3 = vcmask 523264   ;;  %s727_s3 = smov [#allocation4]  }
  0x24   :  { %600 = vmatpush1.bf16.msra.mxu1 %v599_v27  ;;  %v635_v32 = vpop.eup %634  ;;  %616 = vmatprep.subr.bf16.mxu0 %v724_v3  ;;  %v331_v55 = vmax.f32 %v330_v43, 0.0  ;;  %s450_s22 = sshll.u32 %s727_s3, 4  ;;  %s451_s22 = int_to_ptr.vmem [resolvable:$true] %s450_s22 }
  0x25   :  { %601 = vmatprep.subr.bf16.mxu1 %v724_v3  ;;  %v87_v36 = vadd.f32 1.0, %v635_v32  ;;  %s654_s23 = scalar_lea.vmem %s451_s22, 512  ;;  %p659_p1 = scmp.lt.s32.totalorder %s451_s22, %s451_s22 }
  0x26   :  { %v637_v35 = vpop.eup %636  ;;  %p655_p0 = scmp.ne.s32.totalorder %s451_s22, %s654_s23  ;;  %p660_p2 = scmp.lt.s32.totalorder %s654_s23, %s654_s23 }
  0x27   :  { %v86_v37 = vadd.f32 1.0, %v637_v35  ;;  %642 = vlog2.f32 %v87_v36  ;;  %v620_v35 = vpack.c.bf16 %v347_v34, %v346_v33  ;;  %v348_v36 = vld [vmem:[%s1101_s6 + $0x20] sm:$0xff] }
  0x28   :  { %603 = vmatpush1.bf16.msra.mxu1 %v602_v31  ;;  %v345_v31 = vld [vmem:[%s1101_s6 + $0x8] sm:$0xff]  ;;  %p661_p3 = por %p660_p2, %p659_p1 }
  0x29   :  { %v639_v38 = vpop.eup %638  ;;  %604 = vmatprep.subr.bf16.mxu1 %v724_v3  ;;  %644 = vlog2.f32 %v86_v37  ;;  %v617_v32 = vpack.c.bf16 %v345_v31, %v344_v30  ;;  %v349_v37 = vld [vmem:[%s1101_s6 + $0x28] sm:$0xff] }
  0x2a   :  { %v641_v40 = vpop.eup %640  ;;  %v89_v44 = vadd.f32 1.0, %v639_v38  ;;  %v623_v38 = vpack.c.bf16 %v349_v37, %v348_v36  ;;  %p662_p4 = pnand %p661_p3, %p655_p0 }
  0x2b   :  { %v88_v45 = vadd.f32 1.0, %v641_v40  ;;  %v351_v40 = vld [vmem:[%s1101_s6 + $0x38] sm:$0xff] }
  0x2c   :  { %646 = vlog2.f32 %v89_v44  ;;  %606 = vmatpush1.bf16.msra.mxu1 %v605_v39  ;;  %v350_v39 = vld [vmem:[%s1101_s6 + $0x30] sm:$0xff]  ;;  %v332_v44 = vand.u32 2147483647, %v330_v43 }
  0x2d   :  { %648 = vlog2.f32 %v88_v45  ;;  %607 = vmatprep.subr.bf16.mxu1 %v724_v3  ;;  %v626_v41 = vpack.c.bf16 %v351_v40, %v350_v39 }
  0x2e   :  { %v333_v45 = vsub.f32 0.0, %v332_v44 }
  0x30   :  { %609 = vmatpush1.bf16.msra.mxu1 %v608_v46  ;;  %v334_v46 = vmul.f32 1.442695, %v333_v45 }
  0x31   :  { %610 = vmatprep.subr.bf16.mxu1 %v724_v3  ;;  %v643_v57 = vpop.eup %642 }
  0x32   :  { %v93_v2 = vmul.f32 0.6931472, %v643_v57  ;;  %650 = vpow2.f32 %v334_v46 }
  0x33   :  { %v645_v62 = vpop.eup %644 }
  0x34   :  { %612 = vmatpush1.bf16.msra.mxu1 %v611_v51  ;;  %v91_v5 = vmul.f32 0.6931472, %v645_v62  ;;  %v99_v9 = vadd.f32 %v93_v2, %v67_v54 }
  0x35   :  { %613 = vmatprep.subr.bf16.mxu1 %v724_v3 }
  0x36   :  { %v647_v8 = vpop.eup %646  ;;  %v98_v12 = vadd.f32 %v91_v5, %v66_v60  ;;  %v103_v0 = vadd.f32 %v99_v9, %v49_v63 }
  0x37   :  { %v649_v11 = vpop.eup %648  ;;  %v97_v15 = vmul.f32 0.6931472, %v647_v8 }
  0x38   :  { %v95_v1 = vmul.f32 0.6931472, %v649_v11  ;;  %v102_v18 = vadd.f32 %v98_v12, %v45_v4  ;;  %615 = vmatpush1.bf16.msra.mxu1 %v614_v6  ;;  %v107_v20 = vadd.f32 %v103_v0, %v35_v58 }
  0x39   :  { %v101_v19 = vadd.f32 %v97_v15, %v69_v7 }
  0x3a   :  { %v100_v22 = vadd.f32 %v95_v1, %v68_v10  ;;  %v106_v23 = vadd.f32 %v102_v18, %v34_v16  ;;  %111 = vst [vmem:[#allocation4 + $0x8] sm:$0xff] %v107_v20  ;;  %253 = vmatprep.mubr.f32.mxu0 %v107_v20 }
  0x3b   :  { %v105_v24 = vadd.f32 %v101_v19, %v57_v14 }
  0x3c   :  { %v104_v26 = vadd.f32 %v100_v22, %v53_v17  ;;  %110 = vst [vmem:[#allocation4] sm:$0xff] %v106_v23  ;;  %254 = vmatmul.mubr.f32.vlgmr.msra.gmra.mrb[0].mxu0 %v106_v23  ;;  %v651_v47 = vpop.eup %650 }
  0x3d   :  { %v109_v27 = vadd.f32 %v105_v24, %v39_v21  ;;  %618 = vmatpush3.bf16.msra.mxu0 %v617_v32  ;;  %539 = vmatprep.mubr.msk.f32.mxu0 %vm725_vm2, %v726_v42  ;;  %v336_v48 = vadd.f32 1.0, %v651_v47 }
  0x3e   :  { %v108_v28 = vadd.f32 %v104_v26, %v36_v25  ;;  %619 = vmatprep.subr.bf16.mxu0 %v724_v3 }
  0x3f   :  { %114 = vst.msk [vmem:[#allocation4 + $0x18] sm:$0xff] %vm113_vm1, %v109_v27  ;;  %652 = vlog2.f32 %v336_v48 }
  0x40   :  { %112 = vst [vmem:[#allocation4 + $0x10] sm:$0xff] %v108_v28 }
  0x41   :  { %621 = vmatpush3.bf16.msra.mxu0 %v620_v35 }
  0x42   :  { %622 = vmatprep.subr.bf16.mxu0 %v724_v3 }
  0x45   :  { %624 = vmatpush3.bf16.msra.mxu0 %v623_v38 }
  0x46   :  { %v118_v29 = vld [vmem:[#allocation4 + $0x18] sm:$0xff]  ;;  %625 = vmatprep.subr.bf16.mxu0 %v724_v3 }
  0x47   :  { %476 = vmatprep.mubr.msk.f32.mxu1 %vm113_vm1, %v118_v29  ;;  %v475_v3 = vld [vmem:[%s1100_s5] ss:$0 sm:$0xff] }
  0x48   :  { %324 = vmatmul.mubr.f32.vlgmr.msra.gmra.mrb[0].mxu1 %v108_v28 }
  0x49   :  { %627 = vmatpush3.bf16.msra.mxu0 %v626_v41  ;;  %v653_v52 = vpop.eup %652 }
  0x4a   :  { %v338_v56 = vmul.f32 0.6931472, %v653_v52 }
  0x4c   :  { %v339_v60 = vadd.f32 %v338_v56, %v331_v55 }
 0x10f   :  { %v511_v49 = vpop.f32.mrb[0].mxu0 }
 0x110   :  { %v512_v50 = vpop.f32.mrb[1].mxu0 }
 0x111   :  { %v513_v51 = vadd.f32 %v512_v50, %v511_v49 }
 0x113   :  { %v256_v54 = vadd.f32 %v513_v51, %v475_v3 }
 0x11b   :  { %v325_v57 = vpop.f32.mrb[0].mxu1 }
 0x11c   :  { %v326_v59 = vadd.f32 %v325_v57, %v256_v54  ;;  %v327_v61 = vpop.f32.mrb[1].mxu1 }
 0x11e   :  { %v329_v62 = vmax.f32 %v326_v59, 0.0 }
 0x120   :  { %v340_v63 = vadd.f32 %v339_v60, %v329_v62 }
 0x122   :  { %342 = vst.msk [vmem:[#allocation6] sm:$0xff] %vm341_vm3, %v340_v63 }
 0x129   :  { %v343_v2 = vld [vmem:[#allocation6] sm:$0xff] }
 0x12a   :  { %540 = vmatmul.mubr.msk.f32.vlgmr.msra.gmra.mrb[2].mxu0 %vm341_vm3, %v343_v2 }
 0x12b   :  { %665 = shalt.err (!%p662_p4)
}
 0x12c   :  { %s666_s25 = scalar_lea.hbm %s1104_s9, 512 }
 0x12d   :  { %p667_p5 = scmp.ne.s32.totalorder %s1104_s9, %s666_s25  ;;  %p670_p6 = scmp.lt.u32.totalorder %s666_s25, %s1104_s9 }
 0x12f   :  { %p672_p7 = pnand %p670_p6, %p667_p5 }
 0x131   :  { %675 = shalt.err (!%p672_p7)
}
 0x132   :  { %453 = dma.vmem_to_hbm [thread:$0]  %s451_s22, 512, %s1104_s9, [#allocation5]  }
 0x133   :  { %s728_s30 = smov [#allocation6]  }
 0x134   :  { %s460_s11 = sshll.u32 %s728_s30, 4  ;;  %s461_s11 = int_to_ptr.vmem [resolvable:$true] %s460_s11 }
 0x135   :  { %s676_s12 = scalar_lea.vmem %s461_s11, 128  ;;  %p681_p9 = scmp.lt.s32.totalorder %s461_s11, %s461_s11 }
 0x136   :  { %p677_p8 = scmp.ne.s32.totalorder %s461_s11, %s676_s12  ;;  %p682_p10 = scmp.lt.s32.totalorder %s676_s12, %s676_s12 }
 0x138   :  { %p683_p11 = por %p682_p10, %p681_p9 }
 0x13a   :  { %p684_p12 = pnand %p683_p11, %p677_p8 }
 0x13c   :  { %687 = shalt.err (!%p684_p12)
}
 0x13d   :  { %s688_s15 = scalar_lea.hbm %s1105_s10, 128 }
 0x13e   :  { %p689_p13 = scmp.ne.s32.totalorder %s1105_s10, %s688_s15  ;;  %p692_p0 = scmp.lt.u32.totalorder %s688_s15, %s1105_s10 }
 0x140   :  { %p694_p1 = pnand %p692_p0, %p689_p13 }
 0x142   :  { %697 = shalt.err (!%p694_p1)
}
 0x143   :  { %463 = dma.vmem_to_hbm [thread:$0]  %s461_s11, 128, %s1105_s10, [#allocation5]   ;;  %v477_v53 = vld [vmem:[%s1102_s7] ss:$0 sm:$0xff]  ;;  %vm432_vm4 = vcmask 80896  }
 0x144   :  { %s729_s6 = smov [#allocation2]  }
 0x145   :  { %s440_s21 = sshll.u32 %s729_s6, 4  ;;  %s441_s21 = int_to_ptr.vmem [resolvable:$true] %s440_s21 }
 0x146   :  { %s698_s3 = scalar_lea.vmem %s441_s21, 128  ;;  %p703_p3 = scmp.lt.s32.totalorder %s441_s21, %s441_s21 }
 0x147   :  { %p699_p2 = scmp.ne.s32.totalorder %s441_s21, %s698_s3  ;;  %p704_p4 = scmp.lt.s32.totalorder %s698_s3, %s698_s3 }
 0x149   :  { %p705_p5 = por %p704_p4, %p703_p3 }
 0x14b   :  { %p706_p6 = pnand %p705_p5, %p699_p2 }
 0x1fd   :  { %v428_v4 = vpop.f32.mrb[2].mxu0 }
 0x1fe   :  { %v429_v5 = vadd.f32 %v477_v53, %v428_v4  ;;  %v541_v6 = vpop.f32.mrb[3].mxu0 }
 0x200   :  { %433 = vst.msk [vmem:[#allocation2] sm:$0xff] %vm432_vm4, %v429_v5 }
 0x201   :  { %709 = shalt.err (!%p706_p6)
}
 0x202   :  { %s710_s23 = scalar_lea.hbm %s1103_s8, 128 }
 0x203   :  { %p711_p7 = scmp.ne.s32.totalorder %s1103_s8, %s710_s23  ;;  %p714_p8 = scmp.lt.u32.totalorder %s710_s23, %s1103_s8 }
 0x205   :  { %p716_p9 = pnand %p714_p8, %p711_p7 }
 0x207   :  { %719 = shalt.err (!%p716_p9)
}
 0x208   :  { %443 = dma.vmem_to_hbm [thread:$0]  %s441_s21, 128, %s1103_s8, [#allocation3]  }
 0x209   :  { %720 = dma.done.wait [#allocation3], 128  }
 0x20a   :  { %721 = vsyncadd [#allocation3], 4294967168 }
 0x20b   :  { %722 = dma.done.wait [#allocation5], 640  }
 0x20c   :  { %723 = vsyncadd [#allocation5], 4294966656 }
 0x20d   :  { %473 = vsyncpa [#allocation3], 1 }
 0x20e   :  { %474 = vsyncpa [#allocation5], 1 }

</bundles_post_ra>
